<compile_context>
chip_gen: v7x
topology: tpu7x:2x2x1
jax: 0.10.0
libtpu: 0.0.40
codegen_flags: <defaults>
</compile_context>

<pallas_src>
import functools

import jax
import jax.numpy as jnp
from jax import lax
from jax.experimental import pallas as pl
from jax.experimental.pallas import tpu as pltpu


# ----------------------------------------------------------------------------
# Helpers
# ----------------------------------------------------------------------------
def _pick_tile(total, target):
    """Largest tile <= target that divides `total` and is a multiple of 8 (or the full dim)."""
    if total <= target:
        return total
    for t in range(target, 0, -1):
        if total % t == 0 and t % 8 == 0:
            return t
    return total


# ----------------------------------------------------------------------------
# Kernel 1: fused QKV projection  y = x @ [Wq^T*scale | Wk^T | Wv^T]
# ----------------------------------------------------------------------------
def _qkv_proj_kernel(x_ref, w_ref, q_ref, k_ref, v_ref, *, C):
    # x_ref: (tm, C), w_ref: (C, 3C).  qkv_bias=False -> no bias stream at all.
    # TODO(synk): qkv_bias=True would add a (1, 3C) bias input here (scale-folded on the Q part).
    y = jnp.dot(x_ref[...], w_ref[...], preferred_element_type=jnp.float32)  # (tm, 3C)
    q_ref[...] = y[:, 0:C].astype(q_ref.dtype)
    k_ref[...] = y[:, C:2 * C].astype(k_ref.dtype)
    v_ref[...] = y[:, 2 * C:3 * C].astype(v_ref.dtype)


def _qkv_projection(x2d, w_qkv_t, *, block_rows):
    M, C = x2d.shape
    C3 = w_qkv_t.shape[1]
    C_out = C3 // 3
    # TODO(synk): for C >= 2048 in f32 the resident (C, 3C) weight should additionally be tiled
    # along its output-channel dim to stay comfortably inside v7x's 64 MiB physical VMEM.
    return pl.pallas_call(
        functools.partial(_qkv_proj_kernel, C=C_out),
        out_shape=[jax.ShapeDtypeStruct((M, C_out), x2d.dtype)] * 3,
        grid=(M // block_rows,),
        in_specs=[
            pl.BlockSpec((block_rows, C), lambda i: (i, 0)),   # lane-dense row tile of x
            pl.BlockSpec((C, C3), lambda i: (0, 0)),           # fused weight, resident
        ],
        out_specs=[pl.BlockSpec((block_rows, C_out), lambda i: (i, 0))] * 3,
        compiler_params=pltpu.CompilerParams(
            dimension_semantics=("parallel",),
            vmem_limit_bytes=32 * 1024 * 1024,
        ),
    )(x2d, w_qkv_t)


# ----------------------------------------------------------------------------
# Kernel 2: flash-style attention (all heads) + fused output projection
# ----------------------------------------------------------------------------
def _flash_attn_proj_kernel(*refs, H, D, has_bias):
    if has_bias:
        (q_ref, k_ref, v_ref, bias_ref, wp_ref, bp_ref,
         o_ref, m_s, l_s, acc_s) = refs
    else:
        (q_ref, k_ref, v_ref, wp_ref, bp_ref,
         o_ref, m_s, l_s, acc_s) = refs
        bias_ref = None

    ki = pl.program_id(2)
    n_kv = pl.num_programs(2)

    @pl.when(ki == 0)
    def _init():
        m_s[...] = jnp.full(m_s.shape, -jnp.inf, m_s.dtype)
        l_s[...] = jnp.zeros(l_s.shape, l_s.dtype)
        acc_s[...] = jnp.zeros(acc_s.shape, acc_s.dtype)

    q = q_ref[0]  # (tq, C)   softmax scale already folded into the Q weight
    k = k_ref[0]  # (tkv, C)
    v = v_ref[0]  # (tkv, C)

    for h in range(H):  # static unroll over heads; operands stay in the input dtype for the MXU
        cs = slice(h * D, (h + 1) * D)
        s = lax.dot_general(q[:, cs], k[:, cs],
                            (((1,), (1,)), ((), ())),
                            preferred_element_type=jnp.float32)      # (tq, tkv), f32 acc
        if has_bias:
            s = s + bias_ref[0, h]                                   # per-tile streamed bias
        m_prev = m_s[h]                                              # (tq, 1)
        m_new = jnp.maximum(m_prev, jnp.max(s, axis=-1, keepdims=True))
        alpha = jnp.exp(m_prev - m_new)                              # (tq, 1)
        p = jnp.exp(s - m_new)                                       # (tq, tkv), f32 stats
        l_s[h] = alpha * l_s[h] + jnp.sum(p, axis=-1, keepdims=True)
        acc_s[h] = alpha * acc_s[h] + jnp.dot(
            p.astype(v.dtype), v[:, cs], preferred_element_type=jnp.float32)
        m_s[h] = m_new

    @pl.when(ki == n_kv - 1)
    def _finalize():
        tq, C = o_ref.shape[1], o_ref.shape[2]
        wp = wp_ref[...]                                             # (C, C), resident
        y = jnp.zeros((tq, C), jnp.float32)
        for h in range(H):
            # exact normalization (the approx EUP reciprocal was the tolerance miss)
            att_h = (acc_s[h] / l_s[h]).astype(wp.dtype)             # (tq, D)
            y = y + jnp.dot(att_h, wp[h * D:(h + 1) * D, :],
                            preferred_element_type=jnp.float32)
        y = y + bp_ref[...]                                          # (1, C) broadcast
        o_ref[0] = y.astype(o_ref.dtype)                             # direct (B, N, C) layout


def _fused_attention(q, k, v, wp_t, bp, bias, *, num_heads, block_q, block_kv):
    B, N, C = q.shape
    H = num_heads
    D = C // H
    has_bias = bias is not None

    in_specs = [
        pl.BlockSpec((1, block_q, C), lambda b, qi, ki: (b, qi, 0)),
        pl.BlockSpec((1, block_kv, C), lambda b, qi, ki: (b, ki, 0)),
        pl.BlockSpec((1, block_kv, C), lambda b, qi, ki: (b, ki, 0)),
    ]
    args = [q, k, v]
    if has_bias:
        in_specs.append(
            pl.BlockSpec((1, H, block_q, block_kv), lambda b, qi, ki: (b, 0, qi, ki)))
        args.append(bias)
    in_specs += [
        pl.BlockSpec((C, C), lambda b, qi, ki: (0, 0)),   # Wp^T, resident
        pl.BlockSpec((1, C), lambda b, qi, ki: (0, 0)),   # proj bias
    ]
    args += [wp_t, bp]

    kernel = functools.partial(_flash_attn_proj_kernel, H=H, D=D, has_bias=has_bias)
    return pl.pallas_call(
        kernel,
        out_shape=jax.ShapeDtypeStruct((B, N, C), q.dtype),
        grid=(B, N // block_q, N // block_kv),
        in_specs=in_specs,
        out_specs=pl.BlockSpec((1, block_q, C), lambda b, qi, ki: (b, qi, 0)),
        scratch_shapes=[
            pltpu.VMEM((H, block_q, 1), jnp.float32),   # running max m, per head
            pltpu.VMEM((H, block_q, 1), jnp.float32),   # running denom l, per head
            pltpu.VMEM((H, block_q, D), jnp.float32),   # output accumulator, per head
        ],
        compiler_params=pltpu.CompilerParams(
            dimension_semantics=("parallel", "parallel", "arbitrary"),
            vmem_limit_bytes=32 * 1024 * 1024,
        ),
    )(*args)


# ----------------------------------------------------------------------------
# Module-equivalent forward
# ----------------------------------------------------------------------------
def attention_forward(x, fused_params, num_heads, attn_bias=None,
                      *, row_tile=256, q_tile=256, kv_tile=256):
    """Equivalent of Attention.forward.  proj_drop has p=0.0 -> identity."""
    B, N, C = x.shape
    H = num_heads
    assert C % H == 0

    w_qkv_t = fused_params["w_qkv_t"]   # (C, 3C), softmax scale folded into the Q columns
    wp_t = fused_params["wp_t"]         # (C, C)
    bp = fused_params["bp"]             # (1, C)

    # fused QKV projection on flattened rows (x read from HBM once)
    x2d = x.reshape(B * N, C)
    q2d, k2d, v2d = _qkv_projection(x2d, w_qkv_t,
                                    block_rows=_pick_tile(B * N, row_tile))
    q = q2d.reshape(B, N, C)
    k = k2d.reshape(B, N, C)
    v = v2d.reshape(B, N, C)

    bias = None
    if attn_bias is not None:
        # only materialized when the caller actually provides a bias
        bias = jnp.broadcast_to(attn_bias, (B, H, N, N)).astype(jnp.float32)

    out = _fused_attention(q, k, v, wp_t, bp, bias,
                           num_heads=H,
                           block_q=_pick_tile(N, q_tile),
                           block_kv=_pick_tile(N, kv_tile))
    return out.reshape(B, -1, C)


# ----------------------------------------------------------------------------
# Parameters (PyTorch-style) + one-time fusion / scale folding
# ----------------------------------------------------------------------------
def init_params(key, dim):
    ks = jax.random.split(key, 5)
    std = dim ** -0.5

    def w(k):
        return jax.random.normal(k, (dim, dim), dtype=jnp.float32) * std

    return {
        "wq": w(ks[0]), "wk": w(ks[1]), "wv": w(ks[2]),   # (out, in), qkv_bias=False
        "wp": w(ks[3]),
        "bp": jax.random.normal(ks[4], (dim,), dtype=jnp.float32) * 0.02,
    }


def fuse_params(params, scale):
    """Pre-transpose to (in, out), fold the softmax scale into Wq, concat to one (C, 3C) weight."""
    wq_t = params["wq"].T * scale
    wk_t = params["wk"].T
    wv_t = params["wv"].T
    return {
        "w_qkv_t": jnp.concatenate([wq_t, wk_t, wv_t], axis=1),  # (C, 3C)
        "wp_t": params["wp"].T,                                  # (C, C)
        "bp": params["bp"].reshape(1, -1),                       # (1, C)
    }


# ----------------------------------------------------------------------------
# Pure-jnp reference (mirrors the PyTorch module exactly; full-f32 matmuls)
# ----------------------------------------------------------------------------
def _reference(x, params, num_heads, scale, attn_bias=None):
    with jax.default_matmul_precision("highest"):
        B, N, C = x.shape
        H, D = num_heads, C // num_heads
        q = x @ params["wq"].T
        k = x @ params["wk"].T
        v = x @ params["wv"].T

        def sh(t):
            return t.reshape(B, N, H, D).transpose(0, 2, 1, 3)

        q, k, v = sh(q), sh(k), sh(v)
        attn = jnp.einsum("bhnd,bhmd->bhnm", q, k) * scale
        if attn_bias is not None:
            attn = attn + attn_bias
        attn = jax.nn.softmax(attn, axis=-1)
        o = jnp.einsum("bhnm,bhmd->bhnd", attn, v).transpose(0, 2, 1, 3).reshape(B, N, C)
        return o @ params["wp"].T + params["bp"].reshape(1, 1, -1)


if __name__ == "__main__":
    B, N, C = 2, 8, 32
    num_heads = 8
    head_dim = C // num_heads
    scale = head_dim ** -0.5

    key = jax.random.PRNGKey(0)
    kx, kp, kb = jax.random.split(key, 3)
    x = jax.random.normal(kx, (B, N, C), dtype=jnp.float32)
    params = init_params(kp, C)
    fused = fuse_params(params, scale)

    # no-bias path (module default): no zero bias is ever materialized
    out = attention_forward(x, fused, num_heads, attn_bias=None)
    out = jax.block_until_ready(out)
    ref = _reference(x, params, num_heads, scale, attn_bias=None)
    assert out.shape == (B, N, C)
    # headroom for MXU default-precision f32 matmul passes on real hardware
    assert jnp.allclose(out, ref, atol=5e-3, rtol=5e-3), float(jnp.max(jnp.abs(out - ref)))

    # bias path: bias is streamed per (q-tile, kv-tile) block inside the flash loop
    attn_bias = jax.random.normal(kb, (B, num_heads, N, N), dtype=jnp.float32) * 0.5
    out_b = attention_forward(x, fused, num_heads, attn_bias=attn_bias)
    out_b = jax.block_until_ready(out_b)
    ref_b = _reference(x, params, num_heads, scale, attn_bias=attn_bias)
    assert jnp.allclose(out_b, ref_b, atol=5e-3, rtol=5e-3), float(jnp.max(jnp.abs(out_b - ref_b)))

    print("KERNEL_OK")
</pallas_src>

<mosaic_0001>
module attributes {stable_mosaic.version = 11 : i64} {
  func.func @_qkv_proj_kernel(%arg0: i32, %arg1: memref<16x32xf32, #tpu.memory_space<vmem>>, %arg2: memref<32x96xf32, #tpu.memory_space<vmem>>, %arg3: memref<16x32xf32, #tpu.memory_space<vmem>>, %arg4: memref<16x32xf32, #tpu.memory_space<vmem>>, %arg5: memref<16x32xf32, #tpu.memory_space<vmem>>) attributes {dimension_semantics = [#tpu.dimension_semantics<parallel>], iteration_bounds = array<i64: 1>, scalar_prefetch = 0 : i64, scratch_operands = 0 : i64, tpu.core_type = #tpu.core_type<tc>, window_params = [{transform_indices = @transform_0, window_bounds = array<i64: 16, 32>}, {pipeline_mode = #tpu.pipeline_mode<synchronous>, transform_indices = @transform_1, window_bounds = array<i64: 32, 96>}, {transform_indices = @transform_2, window_bounds = array<i64: 16, 32>}, {transform_indices = @transform_3, window_bounds = array<i64: 16, 32>}, {transform_indices = @transform_4, window_bounds = array<i64: 16, 32>}]} {
    %c0 = arith.constant 0 : index
    %c0_0 = arith.constant 0 : index
    %0 = vector.load %arg1[%c0, %c0_0] : memref<16x32xf32, #tpu.memory_space<vmem>>, vector<16x32xf32>
    %c0_1 = arith.constant 0 : index
    %c0_2 = arith.constant 0 : index
    %1 = vector.load %arg2[%c0_1, %c0_2] : memref<32x96xf32, #tpu.memory_space<vmem>>, vector<32x96xf32>
    %cst = arith.constant dense<0.000000e+00> : vector<16x96xf32>
    %2 = tpu.matmul %0, %1, %cst {dimension_numbers = #tpu.dot_dimension_numbers<[1], [0], [0], [1], [0, 0, 1, 1], [], []>} : vector<16x32xf32>, vector<32x96xf32>, vector<16x96xf32> -> vector<16x96xf32>
    %3 = vector.extract_strided_slice %2 {offsets = [0, 0], sizes = [16, 32], strides = [1, 1]} : vector<16x96xf32> to vector<16x32xf32>
    %c0_3 = arith.constant 0 : index
    %c0_4 = arith.constant 0 : index
    %4 = vector.load %arg3[%c0_3, %c0_4] : memref<16x32xf32, #tpu.memory_space<vmem>>, vector<16x32xf32>
    tpu.vector_store %arg3[%c0_3, %c0_4], %3 {strides = array<i32>} : memref<16x32xf32, #tpu.memory_space<vmem>>, vector<16x32xf32>,
    %5 = vector.extract_strided_slice %2 {offsets = [0, 32], sizes = [16, 32], strides = [1, 1]} : vector<16x96xf32> to vector<16x32xf32>
    %c0_5 = arith.constant 0 : index
    %c0_6 = arith.constant 0 : index
    %6 = vector.load %arg4[%c0_5, %c0_6] : memref<16x32xf32, #tpu.memory_space<vmem>>, vector<16x32xf32>
    tpu.vector_store %arg4[%c0_5, %c0_6], %5 {strides = array<i32>} : memref<16x32xf32, #tpu.memory_space<vmem>>, vector<16x32xf32>,
    %7 = vector.extract_strided_slice %2 {offsets = [0, 64], sizes = [16, 32], strides = [1, 1]} : vector<16x96xf32> to vector<16x32xf32>
    %c0_7 = arith.constant 0 : index
    %c0_8 = arith.constant 0 : index
    %8 = vector.load %arg5[%c0_7, %c0_8] : memref<16x32xf32, #tpu.memory_space<vmem>>, vector<16x32xf32>
    tpu.vector_store %arg5[%c0_7, %c0_8], %7 {strides = array<i32>} : memref<16x32xf32, #tpu.memory_space<vmem>>, vector<16x32xf32>,
    return
  }
  func.func @transform_0(%arg0: i32) -> (i32, i32) {
    %c0_i32 = arith.constant 0 : i32
    %c0_i32_0 = arith.constant 0 : i32
    return %arg0, %c0_i32 : i32, i32
  }
  func.func @transform_1(%arg0: i32) -> (i32, i32) {
    %c0_i32 = arith.constant 0 : i32
    %c0_i32_0 = arith.constant 0 : i32
    %c0_i32_1 = arith.constant 0 : i32
    return %c0_i32, %c0_i32_0 : i32, i32
  }
  func.func @transform_2(%arg0: i32) -> (i32, i32) {
    %c0_i32 = arith.constant 0 : i32
    %c0_i32_0 = arith.constant 0 : i32
    return %arg0, %c0_i32 : i32, i32
  }
  func.func @transform_3(%arg0: i32) -> (i32, i32) {
    %c0_i32 = arith.constant 0 : i32
    %c0_i32_0 = arith.constant 0 : i32
    return %arg0, %c0_i32 : i32, i32
  }
  func.func @transform_4(%arg0: i32) -> (i32, i32) {
    %c0_i32 = arith.constant 0 : i32
    %c0_i32_0 = arith.constant 0 : i32
    return %arg0, %c0_i32 : i32, i32
  }
}

</mosaic_0001>

<bundles_post_ra>
// kernel: tpu_custom_call.1
= control target key start
LH: loop header
LB: loop body
LE: loop exit
PB: predicated region body
PF: predicated region fallthrough
CT: control target
= control target key end

     0   :  { %10 = vsyncpa [#allocation3], 0  ;;  %s479_s0 = inlined_call_operand.hbm [shape: f32[16,32], index: 0, kind: input, shape index: {}]   ;;  %s480_s1 = inlined_call_operand.hbm [shape: f32[32,96], index: 1, kind: input, shape index: {}]   ;;  %s481_s2 = inlined_call_operand.hbm [shape: f32[16,32], index: 2, kind: output, shape index: {0}]   ;;  %s482_s3 = inlined_call_operand.hbm [shape: f32[16,32], index: 3, kind: output, shape index: {1}]   ;;  %s483_s4 = inlined_call_operand.hbm [shape: f32[16,32], index: 4, kind: output, shape index: {2}]  }
   0x1   :  { %11 = vsyncpa [#allocation6], 0 }
   0x2   :  { %12 = vsyncpa [#allocation4], 0 }
   0x3   :  { %13 = vsyncpa [#allocation9], 0  ;;  %s355_s15 = smov [#allocation2]   ;;  %s237_s19 = scalar_lea.hbm %s479_s0, 256 }
   0x4   :  { %s19_s16 = sshll.u32 %s355_s15, 4  ;;  %p238_p0 = scmp.ne.s32.totalorder %s479_s0, %s237_s19  ;;  %s20_s16 = int_to_ptr.vmem [resolvable:$true] %s19_s16 }
   0x5   :  { %p241_p1 = scmp.lt.u32.totalorder %s237_s19, %s479_s0 }
   0x7   :  { %p243_p2 = pnand %p241_p1, %p238_p0 }
   0x9   :  { %246 = shalt.err (!%p243_p2)
}
   0xa   :  { %s247_s24 = scalar_lea.vmem %s20_s16, 256  ;;  %p252_p4 = scmp.lt.s32.totalorder %s20_s16, %s20_s16 }
   0xb   :  { %p248_p3 = scmp.ne.s32.totalorder %s20_s16, %s247_s24  ;;  %p253_p5 = scmp.lt.s32.totalorder %s247_s24, %s247_s24 }
   0xd   :  { %p254_p6 = por %p253_p5, %p252_p4 }
   0xf   :  { %p255_p7 = pnand %p254_p6, %p248_p3 }
  0x11   :  { %258 = shalt.err (!%p255_p7)
}
  0x12   :  { %s356_s25 = smov 128   ;;  %s357_s26 = smov 8  }
  0x13   :  { %25 = dma.hbm_to_vmem [thread:$0]  %s479_s0, 256, %s20_s16, [#allocation3], %s356_s25, %s356_s25, %s357_s26  }
  0x14   :  { %s358_s29 = smov [#allocation5]   ;;  %s259_s7 = scalar_lea.hbm %s480_s1, 512 }
  0x15   :  { %s31_s30 = sshll.u32 %s358_s29, 4  ;;  %p260_p8 = scmp.ne.s32.totalorder %s480_s1, %s259_s7  ;;  %s32_s30 = int_to_ptr.vmem [resolvable:$true] %s31_s30 }
  0x16   :  { %p263_p9 = scmp.lt.u32.totalorder %s259_s7, %s480_s1 }
  0x18   :  { %p265_p10 = pnand %p263_p9, %p260_p8 }
  0x1a   :  { %268 = shalt.err (!%p265_p10)
}
  0x1b   :  { %s269_s12 = scalar_lea.vmem %s32_s30, 512  ;;  %p274_p12 = scmp.lt.s32.totalorder %s32_s30, %s32_s30 }
  0x1c   :  { %p270_p11 = scmp.ne.s32.totalorder %s32_s30, %s269_s12  ;;  %p275_p13 = scmp.lt.s32.totalorder %s269_s12, %s269_s12 }
  0x1e   :  { %p276_p0 = por %p275_p13, %p274_p12 }
  0x20   :  { %p277_p1 = pnand %p276_p0, %p270_p11 }
  0x22   :  { %280 = shalt.err (!%p277_p1)
}
  0x23   :  { %37 = dma.hbm_to_vmem [thread:$0]  %s480_s1, 512, %s32_s30, [#allocation6], %s356_s25, %s356_s25, %s357_s26  }
  0x24   :  { %347 = dma.done.wait [#allocation3], 256  }
  0x25   :  { %348 = vsyncadd [#allocation3], 4294967040 }
  0x26   :  { %349 = dma.done.wait [#allocation6], 512  }
  0x27   :  { %350 = vsyncadd [#allocation6], 4294966784  ;;  %vm50_vm0 = vcmask 261120   ;;  %v46_v0 = vld [vmem:[#allocation5] sm:$0xff]  ;;  %v47_v1 = vld [vmem:[#allocation5 + $0x8] sm:$0xff]  ;;  %s359_s1 = smov [#allocation7]  }
  0x28   :  { %v48_v2 = vld [vmem:[#allocation5 + $0x10] sm:$0xff]  ;;  %v220_v3 = vpack.c.bf16 %v47_v1, %v46_v0  ;;  %v49_v4 = vld [vmem:[#allocation5 + $0x18] sm:$0xff]  ;;  %s157_s14 = sshll.u32 %s359_s1, 4  ;;  %s360_s15 = smov 64   ;;  %s158_s14 = int_to_ptr.vmem [resolvable:$true] %s157_s14 }
  0x29   :  { %v44_v5 = vld [vmem:[#allocation2] sm:$0xff]  ;;  %v224_v6 = vpack.c.bf16 %v49_v4, %v48_v2  ;;  %v45_v7 = vld [vmem:[#allocation2 + $0x8] sm:$0xff]  ;;  %s361_s16 = smov 96   ;;  %s281_s17 = scalar_lea.vmem %s158_s14, 256 }
  0x2a   :  { %217 = vmatprep.mubr.msk.f32.mxu0 %vm50_vm0, %v44_v5  ;;  %221 = vmatprep.subr.bf16.mxu0 %v220_v3  ;;  %p282_p2 = scmp.ne.s32.totalorder %s158_s14, %s281_s17  ;;  %p286_p3 = scmp.lt.s32.totalorder %s158_s14, %s158_s14 }
  0x2b   :  { %223 = vmatpush3.bf16.msra.mxu0 %v220_v3  ;;  %p287_p4 = scmp.lt.s32.totalorder %s281_s17, %s281_s17 }
  0x2c   :  { %225 = vmatprep.subr.bf16.mxu0 %v224_v6 }
  0x2d   :  { %p288_p5 = por %p287_p4, %p286_p3 }
  0x2f   :  { %227 = vmatpush3.bf16.msra.mxu0 %v224_v6  ;;  %p289_p6 = pnand %p288_p5, %p282_p2 }
  0x32   :  { %218 = vmatmul.mubr.msk.f32.vlgmr.msra.gmra.mrb[0].mxu0 %vm50_vm0, %v45_v7 }
 0x105   :  { %v219_v8 = vpop.f32.mrb[0].mxu0 }
 0x106   :  { %133 = vst.msk [vmem:[#allocation7 + $0x8] sm:$0xff] %vm50_vm0, %v219_v8  ;;  %v123_v9 = vpop.f32.mrb[1].mxu0 }
 0x107   :  { %132 = vst.msk [vmem:[#allocation7] sm:$0xff] %vm50_vm0, %v123_v9  ;;  %144 = vrot.lane.b32.xlu1 %v123_v9, %s360_s15  ;;  %136 = vrot.lane.b32.xlu0 %v123_v9, %s361_s16 }
 0x108   :  { %292 = shalt.err (!%p289_p6)
}
 0x109   :  { %s293_s20 = scalar_lea.hbm %s481_s2, 256 }
 0x10a   :  { %p294_p7 = scmp.ne.s32.totalorder %s481_s2, %s293_s20  ;;  %p297_p8 = scmp.lt.u32.totalorder %s293_s20, %s481_s2 }
 0x10c   :  { %p299_p9 = pnand %p297_p8, %p294_p7 }
 0x10e   :  { %302 = shalt.err (!%p299_p9)
}
 0x10f   :  { %163 = dma.vmem_to_hbm [thread:$0]  %s158_s14, 256, %s481_s2, [#allocation4], %s356_s25, %s356_s25, %s357_s26  }
 0x110   :  { %146 = vrot.lane.b32.xlu1 %v219_v8, %s360_s15  ;;  %138 = vrot.lane.b32.xlu0 %v219_v8, %s361_s16  ;;  %s362_s29 = smov [#allocation8]   ;;  %s363_s5 = smov [#allocation10]  }
 0x111   :  { %s169_s30 = sshll.u32 %s362_s29, 4  ;;  %s181_s6 = sshll.u32 %s363_s5, 4  ;;  %s170_s30 = int_to_ptr.vmem [resolvable:$true] %s169_s30  ;;  %s440_s6 = int_to_ptr.vmem [resolvable:$true] %s181_s6 }
 0x112   :  { %s303_s2 = scalar_lea.vmem %s170_s30, 256  ;;  %p308_p11 = scmp.lt.s32.totalorder %s170_s30, %s170_s30 }
 0x113   :  { %p304_p10 = scmp.ne.s32.totalorder %s170_s30, %s303_s2  ;;  %p309_p12 = scmp.lt.s32.totalorder %s303_s2, %s303_s2 }
 0x115   :  { %p310_p13 = por %p309_p12, %p308_p11 }
 0x117   :  { %p311_p0 = pnand %p310_p13, %p304_p10 }
 0x179   :  { %v145_v10 = vpop.permute.xlu1 %144  ;;  %v137_v11 = vpop.permute.xlu0 %136 }
 0x17a   :  { %150 = vst.msk [vmem:[#allocation10] sm:$0xff] %vm50_vm0, %v145_v10  ;;  %142 = vst.msk [vmem:[#allocation8] sm:$0xff] %vm50_vm0, %v137_v11 }
 0x182   :  { %v147_v12 = vpop.permute.xlu1 %146  ;;  %v139_v13 = vpop.permute.xlu0 %138 }
 0x183   :  { %151 = vst.msk [vmem:[#allocation10 + $0x8] sm:$0xff] %vm50_vm0, %v147_v12  ;;  %143 = vst.msk [vmem:[#allocation8 + $0x8] sm:$0xff] %vm50_vm0, %v139_v13 }
 0x184   :  { %314 = shalt.err (!%p311_p0)
}
 0x185   :  { %s315_s9 = scalar_lea.hbm %s482_s3, 256 }
 0x186   :  { %p316_p1 = scmp.ne.s32.totalorder %s482_s3, %s315_s9  ;;  %p319_p2 = scmp.lt.u32.totalorder %s315_s9, %s482_s3 }
 0x188   :  { %p321_p3 = pnand %p319_p2, %p316_p1 }
 0x18a   :  { %324 = shalt.err (!%p321_p3)
}
 0x18b   :  { %175 = dma.vmem_to_hbm [thread:$0]  %s170_s30, 256, %s482_s3, [#allocation9], %s356_s25, %s356_s25, %s357_s26  }
 0x18c   :  { %s325_s14 = scalar_lea.vmem %s440_s6, 256  ;;  %p330_p5 = scmp.lt.s32.totalorder %s440_s6, %s440_s6 }
 0x18d   :  { %p326_p4 = scmp.ne.s32.totalorder %s440_s6, %s325_s14  ;;  %p331_p6 = scmp.lt.s32.totalorder %s325_s14, %s325_s14 }
 0x18f   :  { %p332_p7 = por %p331_p6, %p330_p5 }
 0x191   :  { %p333_p8 = pnand %p332_p7, %p326_p4 }
 0x193   :  { %336 = shalt.err (!%p333_p8)
}
 0x194   :  { %s337_s17 = scalar_lea.hbm %s483_s4, 256 }
 0x195   :  { %p338_p9 = scmp.ne.s32.totalorder %s483_s4, %s337_s17  ;;  %p341_p10 = scmp.lt.u32.totalorder %s337_s17, %s483_s4 }
 0x197   :  { %p343_p11 = pnand %p341_p10, %p338_p9 }
 0x199   :  { %346 = shalt.err (!%p343_p11)
}
 0x19a   :  { %187 = dma.vmem_to_hbm [thread:$0]  %s440_s6, 256, %s483_s4, [#allocation9], %s356_s25, %s356_s25, %s357_s26  }
 0x19b   :  { %351 = dma.done.wait [#allocation4], 256  }
 0x19c   :  { %352 = vsyncadd [#allocation4], 4294967040 }
 0x19d   :  { %353 = dma.done.wait [#allocation9], 512  }
 0x19e   :  { %354 = vsyncadd [#allocation9], 4294966784 }
 0x19f   :  { %197 = vsyncpa [#allocation3], 1 }
 0x1a0   :  { %198 = vsyncpa [#allocation6], 1 }
 0x1a1   :  { %199 = vsyncpa [#allocation4], 1 }
 0x1a2   :  { %200 = vsyncpa [#allocation9], 1 }

</bundles_post_ra>
